<compile_context>
chip_gen: v6e
topology: v6e:2x2x1
jax: 0.10.0
libtpu: 0.0.40
codegen_flags: <defaults>
</compile_context>

<pallas_src>
import jax
import jax.numpy as jnp
from jax.experimental import pallas as pl
from jax.experimental.pallas import tpu as pltpu

IN_FEATURES = 3 * 32 * 32   # 3072 (matches torch .view flattening of NCHW)
OUT_FEATURES = 10
N_PAD = 128                 # lane-dense padded output width


def _round_up(n, m):
    return ((n + m - 1) // m) * m


def _tpu_budget():
    """Return (max_tb, vmem_limit_bytes) gated on this chip's VMEM capacity."""
    try:
        vmem_bytes = pltpu.get_tpu_info().vmem_capacity_bytes
    except Exception:
        vmem_bytes = None
    if vmem_bytes is not None and vmem_bytes >= 100 * 1024 * 1024:
        # v5e / v6e: 128 MiB VMEM -> big tiles; explicit high limit is
        # mandatory on v5e whose scoped default is only 16 MiB.
        # Footprint @ tb=2048: 2x24 MiB x + ~3 MiB W + ~2 MiB out ~= 53 MiB.
        return 2048, 96 * 1024 * 1024
    # v7x (64 MiB per-TC VMEM) or unknown generation: conservative tile.
    # Footprint @ tb=1024: 2x12 MiB x + ~3 MiB W + ~1 MiB out ~= 28 MiB.
    return 1024, 48 * 1024 * 1024


def _pick_tb(bs, max_tb):
    """Batch tile: multiple of 8, <= max_tb, and >=2 grid steps when bs > 8
    so the "parallel" batch axis can shard across v7x's two TensorCores and
    the BlockSpec pipeline has something to overlap."""
    tb = min(max_tb, _round_up(bs, 8))
    while tb > 8 and pl.cdiv(bs, tb) < 2:
        tb = max(8, _round_up(tb // 2, 8))
    return tb


def _linear_kernel(x_ref, w_ref, b_ref, o_ref):
    # x_ref: (TB, K)  w_ref: (K, N_PAD)  b_ref: (1, N_PAD)  o_ref: (TB, N_PAD)
    acc = jnp.dot(x_ref[...], w_ref[...], preferred_element_type=jnp.float32)
    o_ref[...] = (acc + b_ref[...]).astype(o_ref.dtype)


def pad_params(w_t, b):
    """Lane-pad params once (init / param-load time), not per forward call."""
    w_pad = jnp.pad(w_t, ((0, 0), (0, N_PAD - OUT_FEATURES)))
    b_pad = jnp.pad(b, (0, N_PAD - OUT_FEATURES)).reshape(1, N_PAD)
    return w_pad, b_pad


def linear_model_forward(x, w_pad, b_pad):
    """x: (bs, 3, 32, 32) float32 NCHW; w_pad: (3072, 128); b_pad: (1, 128).
    Returns (bs, 10) float32, numerically matching nn.Linear on x.view(bs, -1)."""
    bs = x.shape[0]
    x_flat = x.reshape(bs, IN_FEATURES)          # same layout as torch .view

    max_tb, vmem_limit = _tpu_budget()
    tb = _pick_tb(bs, max_tb)
    grid = (pl.cdiv(bs, tb),)                    # ragged final tile; no x pad copy

    out = pl.pallas_call(
        _linear_kernel,
        out_shape=jax.ShapeDtypeStruct((bs, N_PAD), jnp.float32),
        grid_spec=pltpu.PrefetchScalarGridSpec(
            num_scalar_prefetch=0,
            grid=grid,
            in_specs=[
                # x: tiled over batch, double-buffered by the pipeline.
                pl.BlockSpec((tb, IN_FEATURES), lambda i: (i, 0)),
                # W: same block every step -> stays resident in VMEM.
                pl.BlockSpec((IN_FEATURES, N_PAD), lambda i: (0, 0)),
                # bias: resident, lane-dense (1, 128).
                pl.BlockSpec((1, N_PAD), lambda i: (0, 0)),
            ],
            out_specs=pl.BlockSpec((tb, N_PAD), lambda i: (i, 0)),
        ),
        compiler_params=pltpu.CompilerParams(
            # Batch axis is embarrassingly parallel -> megacore sharding on v7x.
            dimension_semantics=("parallel",),
            vmem_limit_bytes=vmem_limit,
        ),
    )(x_flat, w_pad, b_pad)

    # Keep only the real 10 output columns (zero-padded W columns discarded).
    return out[:, :OUT_FEATURES]


def init_params(key):
    """Deterministic init mimicking nn.Linear default (uniform +/- 1/sqrt(fan_in))."""
    k_w, k_b = jax.random.split(key)
    bound = 1.0 / jnp.sqrt(jnp.float32(IN_FEATURES))
    # torch stores weight as (out, in); we keep the transposed (in, out) layout.
    w_t = jax.random.uniform(
        k_w, (IN_FEATURES, OUT_FEATURES), jnp.float32, -bound, bound)
    b = jax.random.uniform(
        k_b, (OUT_FEATURES,), jnp.float32, -bound, bound)
    return w_t, b


if __name__ == "__main__":
    key = jax.random.PRNGKey(0)
    k_x, k_p = jax.random.split(key)

    bs = 2
    x = jax.random.normal(k_x, (bs, 3, 32, 32), jnp.float32)   # NCHW, as PyTorch
    w_t, b = init_params(k_p)
    w_pad, b_pad = pad_params(w_t, b)            # hoisted: padded once, reused

    out = linear_model_forward(x, w_pad, b_pad)
    out = jax.block_until_ready(out)

    # sanity check against plain-JAX reference
    ref = x.reshape(bs, IN_FEATURES) @ w_t + b
    assert out.shape == (bs, OUT_FEATURES)
    assert jnp.allclose(out, ref, atol=1e-4, rtol=1e-4)

    print("KERNEL_OK")
</pallas_src>

<mosaic_0001>
module attributes {stable_mosaic.version = 11 : i64} {
  func.func @_linear_kernel(%arg0: i32, %arg1: memref<8x3072xf32, #tpu.memory_space<vmem>>, %arg2: memref<3072x128xf32, #tpu.memory_space<vmem>>, %arg3: memref<1x128xf32, #tpu.memory_space<vmem>>, %arg4: memref<8x128xf32, #tpu.memory_space<vmem>>) attributes {dimension_semantics = [#tpu.dimension_semantics<parallel>], iteration_bounds = array<i64: 1>, scalar_prefetch = 0 : i64, scratch_operands = 0 : i64, tpu.core_type = #tpu.core_type<tc>, window_params = [{transform_indices = @transform_0, window_bounds = array<i64: 8, 3072>}, {pipeline_mode = #tpu.pipeline_mode<synchronous>, transform_indices = @transform_1, window_bounds = array<i64: 3072, 128>}, {pipeline_mode = #tpu.pipeline_mode<synchronous>, transform_indices = @transform_2, window_bounds = array<i64: 1, 128>}, {transform_indices = @transform_3, window_bounds = array<i64: 8, 128>}]} {
    %c0 = arith.constant 0 : index
    %c0_0 = arith.constant 0 : index
    %0 = vector.load %arg1[%c0, %c0_0] : memref<8x3072xf32, #tpu.memory_space<vmem>>, vector<8x3072xf32>
    %c0_1 = arith.constant 0 : index
    %c0_2 = arith.constant 0 : index
    %1 = vector.load %arg2[%c0_1, %c0_2] : memref<3072x128xf32, #tpu.memory_space<vmem>>, vector<3072x128xf32>
    %cst = arith.constant dense<0.000000e+00> : vector<8x128xf32>
    %2 = tpu.matmul %0, %1, %cst {dimension_numbers = #tpu.dot_dimension_numbers<[1], [0], [0], [1], [0, 0, 1, 1], [], []>} : vector<8x3072xf32>, vector<3072x128xf32>, vector<8x128xf32> -> vector<8x128xf32>
    %c0_3 = arith.constant 0 : index
    %c0_4 = arith.constant 0 : index
    %3 = vector.load %arg3[%c0_3, %c0_4] : memref<1x128xf32, #tpu.memory_space<vmem>>, vector<1x128xf32>
    %4 = vector.broadcast %3 : vector<1x128xf32> to vector<8x128xf32>
    %5 = arith.addf %2, %4 : vector<8x128xf32>
    %c0_5 = arith.constant 0 : index
    %c0_6 = arith.constant 0 : index
    %6 = vector.load %arg4[%c0_5, %c0_6] : memref<8x128xf32, #tpu.memory_space<vmem>>, vector<8x128xf32>
    tpu.vector_store %arg4[%c0_5, %c0_6], %5 {strides = array<i32>} : memref<8x128xf32, #tpu.memory_space<vmem>>, vector<8x128xf32>,
    return
  }
  func.func @transform_0(%arg0: i32) -> (i32, i32) {
    %c0_i32 = arith.constant 0 : i32
    %c0_i32_0 = arith.constant 0 : i32
    return %arg0, %c0_i32 : i32, i32
  }
  func.func @transform_1(%arg0: i32) -> (i32, i32) {
    %c0_i32 = arith.constant 0 : i32
    %c0_i32_0 = arith.constant 0 : i32
    %c0_i32_1 = arith.constant 0 : i32
    return %c0_i32, %c0_i32_0 : i32, i32
  }
  func.func @transform_2(%arg0: i32) -> (i32, i32) {
    %c0_i32 = arith.constant 0 : i32
    %c0_i32_0 = arith.constant 0 : i32
    %c0_i32_1 = arith.constant 0 : i32
    return %c0_i32, %c0_i32_0 : i32, i32
  }
  func.func @transform_3(%arg0: i32) -> (i32, i32) {
    %c0_i32 = arith.constant 0 : i32
    %c0_i32_0 = arith.constant 0 : i32
    return %arg0, %c0_i32 : i32, i32
  }
}

</mosaic_0001>

<bundles_post_ra>
// kernel: tpu_custom_call.1
= control target key start
LH: loop header
LB: loop body
LE: loop exit
PB: predicated region body
PF: predicated region fallthrough
CT: control target
= control target key end

     0   :  { %8 = vsyncpa [#allocation3], 0  ;;  %s2215_s0 = inlined_call_operand.hbm [shape: f32[2,3072], index: 0, kind: input, shape index: {}]   ;;  %s2216_s1 = inlined_call_operand.hbm [shape: f32[3072,128], index: 1, kind: input, shape index: {}]   ;;  %s2217_s2 = inlined_call_operand.hbm [shape: f32[1,128], index: 2, kind: input, shape index: {}]   ;;  %s2218_s3 = inlined_call_operand.hbm [shape: f32[2,128], index: 3, kind: output, shape index: {}]  }
   0x1   :  { %9 = vsyncpa [#allocation6], 0 }
   0x2   :  { %10 = vsyncpa [#allocation4], 0 }
   0x3   :  { %15 = vsyncadd [#allocation3], 2304  ;;  %s2146_s12 = smov [#allocation5]  }
   0x4   :  { %s28_s13 = sshll.u32 %s2146_s12, 4  ;;  %s29_s13 = int_to_ptr.vmem [resolvable:$true] %s28_s13 }
   0x5   :  { %s2068_s14 = scalar_lea.vmem %s29_s13, 49152  ;;  %p2073_p1 = scmp.lt.s32.totalorder %s29_s13, %s29_s13 }
   0x6   :  { %p2069_p0 = scmp.ne.s32.totalorder %s29_s13, %s2068_s14  ;;  %p2074_p2 = scmp.lt.s32.totalorder %s2068_s14, %s2068_s14 }
   0x8   :  { %p2075_p3 = por %p2074_p2, %p2073_p1 }
   0xa   :  { %p2076_p4 = pnand %p2075_p3, %p2069_p0 }
   0xc   :  { %2079 = shalt.err (!%p2076_p4)
}
   0xd   :  { %s2147_s15 = smov 128   ;;  %s2148_s16 = smov 8  }
   0xe   :  { %34 = dma.hbm_to_vmem [thread:$0]  %s2216_s1, 49152, %s29_s13, [#allocation6], %s2147_s15, %s2147_s15, %s2148_s16  }
   0xf   :  { %s2149_s19 = smov [#allocation2]  }
  0x10   :  { %s16_s20 = sshll.u32 %s2149_s19, 4  ;;  %s17_s20 = int_to_ptr.vmem [resolvable:$true] %s16_s20 }
  0x11   :  { %s2088_s21 = scalar_lea.vmem %s17_s20, 768  ;;  %s2092_s22 = scalar_lea.vmem %s17_s20, 3072 }
  0x12   :  { %p2089_p5 = scmp.ne.s32.totalorder %s17_s20, %s2088_s21  ;;  %p2093_p6 = scmp.lt.s32.totalorder %s17_s20, %s17_s20 }
  0x13   :  { %p2094_p7 = scmp.lt.s32.totalorder %s2092_s22, %s2088_s21 }
  0x15   :  { %p2095_p8 = por %p2094_p7, %p2093_p6 }
  0x17   :  { %p2096_p9 = pnand %p2095_p8, %p2089_p5 }
  0x19   :  { %2099 = shalt.err (!%p2096_p9)
}
  0x1a   :  { %s2150_s23 = smov 768   ;;  %s2151_s24 = smov 48  }
  0x1b   :  { %22 = dma.hbm_to_vmem [thread:$0]  %s2215_s0, 768, %s17_s20, [#allocation3], %s2150_s23, %s2150_s23, %s2151_s24  }
  0x1c   :  { %s2152_s27 = smov [#allocation7]  }
  0x1d   :  { %s41_s28 = sshll.u32 %s2152_s27, 4  ;;  %s42_s28 = int_to_ptr.vmem [resolvable:$true] %s41_s28 }
  0x1e   :  { %s2108_s1 = scalar_lea.vmem %s42_s28, 16  ;;  %s2112_s29 = scalar_lea.vmem %s42_s28, 32 }
  0x1f   :  { %p2109_p10 = scmp.ne.s32.totalorder %s42_s28, %s2108_s1  ;;  %p2113_p11 = scmp.lt.s32.totalorder %s42_s28, %s42_s28 }
  0x20   :  { %p2114_p12 = scmp.lt.s32.totalorder %s2112_s29, %s2108_s1 }
  0x22   :  { %p2115_p13 = por %p2114_p12, %p2113_p11 }
  0x24   :  { %p2116_p0 = pnand %p2115_p13, %p2109_p10 }
  0x26   :  { %2119 = shalt.err (!%p2116_p0)
}
  0x27   :  { %44 = dma.hbm_to_vmem [thread:$0]  %s2217_s2, 16, %s42_s28, [#allocation6]  }
  0x28   :  { %2140 = dma.done.wait [#allocation3], 3072  }
  0x29   :  { %2141 = vsyncadd [#allocation3], 4294964224 }
  0x2a   :  { %2142 = dma.done.wait [#allocation6], 49168  }
  0x2b   :  { %2143 = vsyncadd [#allocation6], 4294918128  ;;  %v109_v0 = vld [vmem:[#allocation5 + $0xf8] sm:$0xff]  ;;  %v108_v4 = vld [vmem:[#allocation5 + $0xf0] sm:$0xff]  ;;  %v2153_v30 = vmov 1983009808   ;;  %v500_v32 = vlaneseq }
  0x2c   :  { %v141_v1 = vld [vmem:[#allocation5 + $0x1f8] sm:$0xff]  ;;  %1593 = vmatprep.subr.mxu0 %v109_v0  ;;  %v140_v5 = vld [vmem:[#allocation5 + $0x1f0] sm:$0xff]  ;;  %v107_v8 = vld [vmem:[#allocation5 + $0xe8] sm:$0xff]  ;;  %v498_v31 = vunpack.c.l.s4 %v2153_v30 }
  0x2d   :  { %v93_v2 = vld [vmem:[#allocation5 + $0x78] sm:$0xff]  ;;  %1628 = vmatprep.subr.mxu1 %v141_v1  ;;  %v92_v6 = vld [vmem:[#allocation5 + $0x70] sm:$0xff]  ;;  %v139_v9 = vld [vmem:[#allocation5 + $0x1e8] sm:$0xff]  ;;  %v501_v42 = vshrl.u32 %v500_v32, 7 }
  0x2e   :  { %v125_v3 = vld [vmem:[#allocation5 + $0x178] sm:$0xff]  ;;  %1594 = vmatpush3.msra.mxu0 %v93_v2  ;;  %v124_v7 = vld [vmem:[#allocation5 + $0x170] sm:$0xff]  ;;  %v91_v10 = vld [vmem:[#allocation5 + $0x68] sm:$0xff]  ;;  %v499_v41 = vunpack.c.0.s8 %v498_v31 }
  0x2f   :  { %1629 = vmatpush3.msra.mxu1 %v125_v3  ;;  %1595 = vmatprep.subr.mxu0 %v108_v4  ;;  %v123_v11 = vld [vmem:[#allocation5 + $0x168] sm:$0xff]  ;;  %v106_v12 = vld [vmem:[#allocation5 + $0xe0] sm:$0xff]  ;;  %v105_v16 = vld [vmem:[#allocation5 + $0xd8] sm:$0xff] }
  0x30   :  { %1630 = vmatprep.subr.mxu1 %v140_v5  ;;  %1596 = vmatpush3.msra.mxu0 %v92_v6  ;;  %v138_v13 = vld [vmem:[#allocation5 + $0x1e0] sm:$0xff]  ;;  %v137_v17 = vld [vmem:[#allocation5 + $0x1d8] sm:$0xff]  ;;  %v104_v20 = vld [vmem:[#allocation5 + $0xd0] sm:$0xff]  ;;  %v2186_v55 = vsub.s32 %v499_v41, %v501_v42 }
  0x31   :  { %1631 = vmatpush3.msra.mxu1 %v124_v7  ;;  %1597 = vmatprep.subr.mxu0 %v107_v8  ;;  %v90_v14 = vld [vmem:[#allocation5 + $0x60] sm:$0xff]  ;;  %v89_v18 = vld [vmem:[#allocation5 + $0x58] sm:$0xff]  ;;  %v136_v21 = vld [vmem:[#allocation5 + $0x1d0] sm:$0xff] }
  0x32   :  { %1632 = vmatprep.subr.mxu1 %v139_v9  ;;  %v122_v15 = vld [vmem:[#allocation5 + $0x160] sm:$0xff]  ;;  %1598 = vmatpush3.msra.mxu0 %v91_v10  ;;  %v121_v19 = vld [vmem:[#allocation5 + $0x158] sm:$0xff]  ;;  %v88_v22 = vld [vmem:[#allocation5 + $0x50] sm:$0xff] }
  0x33   :  { %1633 = vmatpush3.msra.mxu1 %v123_v11  ;;  %1599 = vmatprep.subr.mxu0 %v106_v12  ;;  %v120_v23 = vld [vmem:[#allocation5 + $0x150] sm:$0xff]  ;;  %v103_v24 = vld [vmem:[#allocation5 + $0xc8] sm:$0xff]  ;;  %v102_v28 = vld [vmem:[#allocation5 + $0xc0] sm:$0xff] }
  0x34   :  { %1634 = vmatprep.subr.mxu1 %v138_v13  ;;  %1600 = vmatpush3.msra.mxu0 %v90_v14  ;;  %v135_v25 = vld [vmem:[#allocation5 + $0x1c8] sm:$0xff]  ;;  %v134_v29 = vld [vmem:[#allocation5 + $0x1c0] sm:$0xff]  ;;  %v101_v35 = vld [vmem:[#allocation5 + $0xb8] sm:$0xff] }
  0x35   :  { %1635 = vmatpush3.msra.mxu1 %v122_v15  ;;  %1601 = vmatprep.subr.mxu0 %v105_v16  ;;  %v87_v26 = vld [vmem:[#allocation5 + $0x48] sm:$0xff]  ;;  %v86_v33 = vld [vmem:[#allocation5 + $0x40] sm:$0xff]  ;;  %v133_v36 = vld [vmem:[#allocation5 + $0x1b8] sm:$0xff] }
  0x36   :  { %1636 = vmatprep.subr.mxu1 %v137_v17  ;;  %1602 = vmatpush3.msra.mxu0 %v89_v18  ;;  %v119_v27 = vld [vmem:[#allocation5 + $0x148] sm:$0xff]  ;;  %v118_v34 = vld [vmem:[#allocation5 + $0x140] sm:$0xff]  ;;  %v85_v37 = vld [vmem:[#allocation5 + $0x38] sm:$0xff] }
  0x37   :  { %1637 = vmatpush3.msra.mxu1 %v121_v19  ;;  %1603 = vmatprep.subr.mxu0 %v104_v20  ;;  %v117_v38 = vld [vmem:[#allocation5 + $0x138] sm:$0xff]  ;;  %v100_v39 = vld [vmem:[#allocation5 + $0xb0] sm:$0xff]  ;;  %v99_v45 = vld [vmem:[#allocation5 + $0xa8] sm:$0xff] }
  0x38   :  { %1638 = vmatprep.subr.mxu1 %v136_v21  ;;  %1604 = vmatpush3.msra.mxu0 %v88_v22  ;;  %v132_v40 = vld [vmem:[#allocation5 + $0x1b0] sm:$0xff]  ;;  %v131_v46 = vld [vmem:[#allocation5 + $0x1a8] sm:$0xff]  ;;  %v98_v49 = vld [vmem:[#allocation5 + $0xa0] sm:$0xff] }
  0x39   :  { %1639 = vmatpush3.msra.mxu1 %v120_v23  ;;  %1605 = vmatprep.subr.mxu0 %v103_v24  ;;  %v84_v43 = vld [vmem:[#allocation5 + $0x30] sm:$0xff]  ;;  %v83_v47 = vld [vmem:[#allocation5 + $0x28] sm:$0xff]  ;;  %v130_v50 = vld [vmem:[#allocation5 + $0x1a0] sm:$0xff] }
  0x3a   :  { %1640 = vmatprep.subr.mxu1 %v135_v25  ;;  %1606 = vmatpush3.msra.mxu0 %v87_v26  ;;  %v116_v44 = vld [vmem:[#allocation5 + $0x130] sm:$0xff]  ;;  %v115_v48 = vld [vmem:[#allocation5 + $0x128] sm:$0xff]  ;;  %v82_v51 = vld [vmem:[#allocation5 + $0x20] sm:$0xff] }
  0x3b   :  { %1641 = vmatpush3.msra.mxu1 %v119_v27  ;;  %1607 = vmatprep.subr.mxu0 %v102_v28  ;;  %v114_v52 = vld [vmem:[#allocation5 + $0x120] sm:$0xff]  ;;  %v97_v53 = vld [vmem:[#allocation5 + $0x98] sm:$0xff]  ;;  %v96_v62 = vld [vmem:[#allocation5 + $0x90] sm:$0xff] }
  0x3c   :  { %1642 = vmatprep.subr.mxu1 %v134_v29  ;;  %1608 = vmatpush3.msra.mxu0 %v86_v33  ;;  %v129_v54 = vld [vmem:[#allocation5 + $0x198] sm:$0xff]  ;;  %v2024_v57 = vld [vmem:[#allocation2] ss:$48 sps:$4 sm:$0xff]   ;;  %v2028_v60 = vld [vmem:[#allocation2 + $0x4] ss:$48 sps:$4 sm:$0xff]  }
  0x3d   :  { %1643 = vmatpush3.msra.mxu1 %v118_v34  ;;  %1609 = vmatprep.subr.mxu0 %v101_v35  ;;  %v81_v56 = vld [vmem:[#allocation5 + $0x18] sm:$0xff]  ;;  %v2026_v58 = vld [vmem:[#allocation2 + $0x60] ss:$48 sps:$4 sm:$0xff]   ;;  %v2029_v61 = vld [vmem:[#allocation2 + $0x64] ss:$48 sps:$4 sm:$0xff]   ;;  %v503_v0 = vrot.slane %v2024_v57, %v2186_v55  ;;  %v510_v6 = vrot.slane %v2028_v60, %v2186_v55 }
  0x3e   :  { %1644 = vmatprep.subr.mxu1 %v133_v36  ;;  %1610 = vmatpush3.msra.mxu0 %v85_v37  ;;  %v113_v59 = vld [vmem:[#allocation5 + $0x118] sm:$0xff]  ;;  %v128_v63 = vld [vmem:[#allocation5 + $0x190] sm:$0xff]  ;;  %v517_v1 = vrot.slane %v2026_v58, %v2186_v55  ;;  %v95_v4 = vld [vmem:[#allocation5 + $0x88] sm:$0xff]  ;;  %v524_v7 = vrot.slane %v2029_v61, %v2186_v55 }
  0x3f   :  { %1645 = vmatpush3.msra.mxu1 %v117_v38  ;;  %1611 = vmatprep.subr.mxu0 %v100_v39  ;;  %v80_v2 = vld [vmem:[#allocation5 + $0x10] sm:$0xff]  ;;  %v127_v5 = vld [vmem:[#allocation5 + $0x188] sm:$0xff]  ;;  %v94_v10 = vld [vmem:[#allocation5 + $0x80] sm:$0xff] }
  0x40   :  { %1646 = vmatprep.subr.mxu1 %v132_v40  ;;  %1612 = vmatpush3.msra.mxu0 %v84_v43  ;;  %v112_v3 = vld [vmem:[#allocation5 + $0x110] sm:$0xff]  ;;  %v79_v8 = vld [vmem:[#allocation5 + $0x8] sm:$0xff]  ;;  %v126_v11 = vld [vmem:[#allocation5 + $0x180] sm:$0xff]  ;;  %v526_v12 = vcombine.high %v503_v0, %v517_v1  ;;  %v525_v14 = vcombine.low %v503_v0, %v517_v1  ;;  %v528_v16 = vcombine.high %v510_v6, %v524_v7 }
  0x41   :  { %1647 = vmatpush3.msra.mxu1 %v116_v44  ;;  %1613 = vmatprep.subr.mxu0 %v99_v45  ;;  %v111_v9 = vld [vmem:[#allocation5 + $0x108] sm:$0xff]  ;;  %v78_v13 = vld [vmem:[#allocation5] sm:$0xff]  ;;  %v173_v17 = vld [vmem:[#allocation5 + $0x2f8] sm:$0xff]  ;;  %v527_v18 = vcombine.low %v510_v6, %v524_v7 }
  0x42   :  { %1648 = vmatprep.subr.mxu1 %v131_v46  ;;  %1614 = vmatpush3.msra.mxu0 %v83_v47  ;;  %v110_v15 = vld [vmem:[#allocation5 + $0x100] sm:$0xff]  ;;  %v205_v19 = vld [vmem:[#allocation5 + $0x3f8] sm:$0xff]  ;;  %v172_v22 = vld [vmem:[#allocation5 + $0x2f0] sm:$0xff] }
  0x43   :  { %1649 = vmatpush3.msra.mxu1 %v115_v48  ;;  %1615 = vmatprep.subr.mxu0 %v98_v49  ;;  %v157_v20 = vld [vmem:[#allocation5 + $0x278] sm:$0xff]  ;;  %v204_v23 = vld [vmem:[#allocation5 + $0x3f0] sm:$0xff]  ;;  %v171_v26 = vld [vmem:[#allocation5 + $0x2e8] sm:$0xff] }
  0x44   :  { %1650 = vmatprep.subr.mxu1 %v130_v50  ;;  %1616 = vmatpush3.msra.mxu0 %v82_v51  ;;  %v189_v21 = vld [vmem:[#allocation5 + $0x378] sm:$0xff]  ;;  %v156_v24 = vld [vmem:[#allocation5 + $0x270] sm:$0xff]  ;;  %v203_v27 = vld [vmem:[#allocation5 + $0x3e8] sm:$0xff] }
  0x45   :  { %1651 = vmatpush3.msra.mxu1 %v114_v52  ;;  %1617 = vmatprep.subr.mxu0 %v97_v53  ;;  %v188_v25 = vld [vmem:[#allocation5 + $0x370] sm:$0xff]  ;;  %v155_v28 = vld [vmem:[#allocation5 + $0x268] sm:$0xff]  ;;  %v170_v30 = vld [vmem:[#allocation5 + $0x2e0] sm:$0xff] }
  0x46   :  { %1652 = vmatprep.subr.mxu1 %v129_v54  ;;  %1618 = vmatpush3.msra.mxu0 %v81_v56  ;;  %v187_v29 = vld [vmem:[#allocation5 + $0x368] sm:$0xff]  ;;  %v202_v31 = vld [vmem:[#allocation5 + $0x3e0] sm:$0xff]  ;;  %v169_v34 = vld [vmem:[#allocation5 + $0x2d8] sm:$0xff] }
  0x47   :  { %1653 = vmatpush3.msra.mxu1 %v113_v59  ;;  %1619 = vmatprep.subr.mxu0 %v96_v62  ;;  %v154_v32 = vld [vmem:[#allocation5 + $0x260] sm:$0xff]  ;;  %v201_v35 = vld [vmem:[#allocation5 + $0x3d8] sm:$0xff]  ;;  %v168_v38 = vld [vmem:[#allocation5 + $0x2d0] sm:$0xff] }
  0x48   :  { %1654 = vmatprep.subr.mxu1 %v128_v63  ;;  %1620 = vmatpush3.msra.mxu0 %v80_v2  ;;  %v186_v33 = vld [vmem:[#allocation5 + $0x360] sm:$0xff]  ;;  %v153_v36 = vld [vmem:[#allocation5 + $0x258] sm:$0xff]  ;;  %v200_v39 = vld [vmem:[#allocation5 + $0x3d0] sm:$0xff] }
  0x49   :  { %1655 = vmatpush3.msra.mxu1 %v112_v3  ;;  %1621 = vmatprep.subr.mxu0 %v95_v4  ;;  %v185_v37 = vld [vmem:[#allocation5 + $0x358] sm:$0xff]  ;;  %v152_v40 = vld [vmem:[#allocation5 + $0x250] sm:$0xff]  ;;  %v167_v42 = vld [vmem:[#allocation5 + $0x2c8] sm:$0xff] }
  0x4a   :  { %1656 = vmatprep.subr.mxu1 %v127_v5  ;;  %1622 = vmatpush3.msra.mxu0 %v79_v8  ;;  %v184_v41 = vld [vmem:[#allocation5 + $0x350] sm:$0xff]  ;;  %v199_v43 = vld [vmem:[#allocation5 + $0x3c8] sm:$0xff]  ;;  %v166_v46 = vld [vmem:[#allocation5 + $0x2c0] sm:$0xff] }
  0x4b   :  { %1657 = vmatpush3.msra.mxu1 %v111_v9  ;;  %1623 = vmatprep.subr.mxu0 %v94_v10  ;;  %v151_v44 = vld [vmem:[#allocation5 + $0x248] sm:$0xff]  ;;  %v198_v47 = vld [vmem:[#allocation5 + $0x3c0] sm:$0xff]  ;;  %v165_v50 = vld [vmem:[#allocation5 + $0x2b8] sm:$0xff] }
  0x4c   :  { %1658 = vmatprep.subr.mxu1 %v126_v11  ;;  %1624 = vmatpush3.msra.mxu0 %v78_v13  ;;  %v183_v45 = vld [vmem:[#allocation5 + $0x348] sm:$0xff]  ;;  %v150_v48 = vld [vmem:[#allocation5 + $0x240] sm:$0xff]  ;;  %v197_v51 = vld [vmem:[#allocation5 + $0x3b8] sm:$0xff] }
  0x4d   :  { %797 = vmatprep.mubr.f32.mxu0 %v526_v12  ;;  %1659 = vmatpush3.msra.mxu1 %v110_v15  ;;  %v182_v49 = vld [vmem:[#allocation5 + $0x340] sm:$0xff]  ;;  %v149_v52 = vld [vmem:[#allocation5 + $0x238] sm:$0xff]  ;;  %v164_v54 = vld [vmem:[#allocation5 + $0x2b0] sm:$0xff] }
  0x4e   :  { %798 = vmatmul.mubr.f32.vlgmr.msra.gmra.mxu0 %v525_v14  ;;  %867 = vmatprep.mubr.f32.mxu1 %v528_v16  ;;  %v181_v53 = vld [vmem:[#allocation5 + $0x338] sm:$0xff]  ;;  %v196_v56 = vld [vmem:[#allocation5 + $0x3b0] sm:$0xff]  ;;  %v163_v59 = vld [vmem:[#allocation5 + $0x2a8] sm:$0xff] }
  0x4f   :  { %1663 = vmatprep.subr.mxu0 %v173_v17  ;;  %1698 = vmatprep.subr.mxu1 %v205_v19  ;;  %v148_v57 = vld [vmem:[#allocation5 + $0x230] sm:$0xff]  ;;  %v195_v60 = vld [vmem:[#allocation5 + $0x3a8] sm:$0xff]  ;;  %v162_v63 = vld [vmem:[#allocation5 + $0x2a0] sm:$0xff] }
  0x50   :  { %868 = vmatmul.mubr.f32.vlgmr.msra.gmra.mxu1 %v527_v18  ;;  %1664 = vmatpush3.msra.mxu0 %v157_v20  ;;  %v180_v58 = vld [vmem:[#allocation5 + $0x330] sm:$0xff]  ;;  %v147_v61 = vld [vmem:[#allocation5 + $0x228] sm:$0xff]  ;;  %v194_v0 = vld [vmem:[#allocation5 + $0x3a0] sm:$0xff] }
  0x51   :  { %1699 = vmatpush3.msra.mxu1 %v189_v21  ;;  %1665 = vmatprep.subr.mxu0 %v172_v22  ;;  %v179_v62 = vld [vmem:[#allocation5 + $0x328] sm:$0xff]  ;;  %v146_v3 = vld [vmem:[#allocation5 + $0x220] sm:$0xff]  ;;  %v161_v5 = vld [vmem:[#allocation5 + $0x298] sm:$0xff] }
  0x52   :  { %1700 = vmatprep.subr.mxu1 %v204_v23  ;;  %1666 = vmatpush3.msra.mxu0 %v156_v24  ;;  %v2030_v1 = vld [vmem:[#allocation2 + $0x8] ss:$48 sps:$4 sm:$0xff]   ;;  %v178_v4 = vld [vmem:[#allocation5 + $0x320] sm:$0xff]  ;;  %v2034_v7 = vld [vmem:[#allocation2 + $0xc] ss:$48 sps:$4 sm:$0xff]  }
  0x53   :  { %1701 = vmatpush3.msra.mxu1 %v188_v25  ;;  %1667 = vmatprep.subr.mxu0 %v171_v26  ;;  %v2032_v2 = vld [vmem:[#allocation2 + $0x68] ss:$48 sps:$4 sm:$0xff]   ;;  %v2035_v8 = vld [vmem:[#allocation2 + $0x6c] ss:$48 sps:$4 sm:$0xff]   ;;  %v160_v11 = vld [vmem:[#allocation5 + $0x290] sm:$0xff]  ;;  %v539_v13 = vrot.slane %v2030_v1, %v2186_v55  ;;  %v546_v19 = vrot.slane %v2034_v7, %v2186_v55 }
  0x54   :  { %1702 = vmatprep.subr.mxu1 %v203_v27  ;;  %1668 = vmatpush3.msra.mxu0 %v155_v28  ;;  %v193_v6 = vld [vmem:[#allocation5 + $0x398] sm:$0xff]  ;;  %v192_v12 = vld [vmem:[#allocation5 + $0x390] sm:$0xff]  ;;  %v553_v14 = vrot.slane %v2032_v2, %v2186_v55  ;;  %v159_v17 = vld [vmem:[#allocation5 + $0x288] sm:$0xff]  ;;  %v560_v20 = vrot.slane %v2035_v8, %v2186_v55 }
  0x55   :  { %1703 = vmatpush3.msra.mxu1 %v187_v29  ;;  %1669 = vmatprep.subr.mxu0 %v170_v30  ;;  %v145_v9 = vld [vmem:[#allocation5 + $0x218] sm:$0xff]  ;;  %v144_v15 = vld [vmem:[#allocation5 + $0x210] sm:$0xff]  ;;  %v191_v18 = vld [vmem:[#allocation5 + $0x388] sm:$0xff] }
  0x56   :  { %1704 = vmatprep.subr.mxu1 %v202_v31  ;;  %1670 = vmatpush3.msra.mxu0 %v154_v32  ;;  %v177_v10 = vld [vmem:[#allocation5 + $0x318] sm:$0xff]  ;;  %v176_v16 = vld [vmem:[#allocation5 + $0x310] sm:$0xff]  ;;  %v143_v21 = vld [vmem:[#allocation5 + $0x208] sm:$0xff]  ;;  %v562_v25 = vcombine.high %v539_v13, %v553_v14  ;;  %v561_v27 = vcombine.low %v539_v13, %v553_v14  ;;  %v564_v29 = vcombine.high %v546_v19, %v560_v20 }
  0x57   :  { %1705 = vmatpush3.msra.mxu1 %v186_v33  ;;  %1671 = vmatprep.subr.mxu0 %v169_v34  ;;  %v175_v22 = vld [vmem:[#allocation5 + $0x308] sm:$0xff]  ;;  %v158_v23 = vld [vmem:[#allocation5 + $0x280] sm:$0xff]  ;;  %v237_v30 = vld [vmem:[#allocation5 + $0x4f8] sm:$0xff]  ;;  %v563_v31 = vcombine.low %v546_v19, %v560_v20 }
  0x58   :  { %1706 = vmatprep.subr.mxu1 %v201_v35  ;;  %1672 = vmatpush3.msra.mxu0 %v153_v36  ;;  %v190_v24 = vld [vmem:[#allocation5 + $0x380] sm:$0xff]  ;;  %v269_v32 = vld [vmem:[#allocation5 + $0x5f8] sm:$0xff]  ;;  %v236_v35 = vld [vmem:[#allocation5 + $0x4f0] sm:$0xff] }
  0x59   :  { %1707 = vmatpush3.msra.mxu1 %v185_v37  ;;  %1673 = vmatprep.subr.mxu0 %v168_v38  ;;  %v142_v26 = vld [vmem:[#allocation5 + $0x200] sm:$0xff]  ;;  %v221_v33 = vld [vmem:[#allocation5 + $0x478] sm:$0xff]  ;;  %v268_v36 = vld [vmem:[#allocation5 + $0x5f0] sm:$0xff] }
  0x5a   :  { %1708 = vmatprep.subr.mxu1 %v200_v39  ;;  %1674 = vmatpush3.msra.mxu0 %v152_v40  ;;  %v174_v28 = vld [vmem:[#allocation5 + $0x300] sm:$0xff]  ;;  %v253_v34 = vld [vmem:[#allocation5 + $0x578] sm:$0xff]  ;;  %v220_v37 = vld [vmem:[#allocation5 + $0x470] sm:$0xff] }
  0x5b   :  { %1709 = vmatpush3.msra.mxu1 %v184_v41  ;;  %1675 = vmatprep.subr.mxu0 %v167_v42  ;;  %v252_v38 = vld [vmem:[#allocation5 + $0x570] sm:$0xff]  ;;  %v235_v39 = vld [vmem:[#allocation5 + $0x4e8] sm:$0xff]  ;;  %v261_v1 = vld [vmem:[#allocation5 + $0x5b8] sm:$0xff] }
  0x5c   :  { %1710 = vmatprep.subr.mxu1 %v199_v43  ;;  %1676 = vmatpush3.msra.mxu0 %v151_v44  ;;  %v267_v40 = vld [vmem:[#allocation5 + $0x5e8] sm:$0xff]  ;;  %v234_v43 = vld [vmem:[#allocation5 + $0x4e0] sm:$0xff]  ;;  %v213_v2 = vld [vmem:[#allocation5 + $0x438] sm:$0xff] }
  0x5d   :  { %1711 = vmatpush3.msra.mxu1 %v183_v45  ;;  %1677 = vmatprep.subr.mxu0 %v166_v46  ;;  %v219_v41 = vld [vmem:[#allocation5 + $0x468] sm:$0xff]  ;;  %v266_v44 = vld [vmem:[#allocation5 + $0x5e0] sm:$0xff]  ;;  %v244_v7 = vld [vmem:[#allocation5 + $0x530] sm:$0xff] }
  0x5e   :  { %1712 = vmatprep.subr.mxu1 %v198_v47  ;;  %1678 = vmatpush3.msra.mxu0 %v150_v48  ;;  %v251_v42 = vld [vmem:[#allocation5 + $0x568] sm:$0xff]  ;;  %v218_v45 = vld [vmem:[#allocation5 + $0x460] sm:$0xff]  ;;  %v233_v47 = vld [vmem:[#allocation5 + $0x4d8] sm:$0xff] }
  0x5f   :  { %1713 = vmatpush3.msra.mxu1 %v182_v49  ;;  %1679 = vmatprep.subr.mxu0 %v165_v50  ;;  %v250_v46 = vld [vmem:[#allocation5 + $0x560] sm:$0xff]  ;;  %v265_v48 = vld [vmem:[#allocation5 + $0x5d8] sm:$0xff]  ;;  %v227_v8 = vld [vmem:[#allocation5 + $0x4a8] sm:$0xff] }
  0x60   :  { %1714 = vmatprep.subr.mxu1 %v197_v51  ;;  %1680 = vmatpush3.msra.mxu0 %v149_v52  ;;  %v217_v49 = vld [vmem:[#allocation5 + $0x458] sm:$0xff]  ;;  %v232_v51 = vld [vmem:[#allocation5 + $0x4d0] sm:$0xff]  ;;  %v258_v13 = vld [vmem:[#allocation5 + $0x5a0] sm:$0xff] }
  0x61   :  { %1715 = vmatpush3.msra.mxu1 %v181_v53  ;;  %1681 = vmatprep.subr.mxu0 %v164_v54  ;;  %v249_v50 = vld [vmem:[#allocation5 + $0x558] sm:$0xff]  ;;  %v264_v52 = vld [vmem:[#allocation5 + $0x5d0] sm:$0xff] }
  0x62   :  { %1716 = vmatprep.subr.mxu1 %v196_v56  ;;  %1682 = vmatpush3.msra.mxu0 %v148_v57  ;;  %v216_v53 = vld [vmem:[#allocation5 + $0x450] sm:$0xff]  ;;  %v231_v56 = vld [vmem:[#allocation5 + $0x4c8] sm:$0xff]  ;;  %v257_v19 = vld [vmem:[#allocation5 + $0x598] sm:$0xff] }
  0x63   :  { %1717 = vmatpush3.msra.mxu1 %v180_v58  ;;  %1683 = vmatprep.subr.mxu0 %v163_v59  ;;  %v248_v54 = vld [vmem:[#allocation5 + $0x550] sm:$0xff]  ;;  %v263_v57 = vld [vmem:[#allocation5 + $0x5c8] sm:$0xff] }
  0x64   :  { %1718 = vmatprep.subr.mxu1 %v195_v60  ;;  %1684 = vmatpush3.msra.mxu0 %v147_v61  ;;  %v215_v58 = vld [vmem:[#allocation5 + $0x448] sm:$0xff]  ;;  %v230_v60 = vld [vmem:[#allocation5 + $0x4c0] sm:$0xff] }
  0x65   :  { %1719 = vmatpush3.msra.mxu1 %v179_v62  ;;  %1685 = vmatprep.subr.mxu0 %v162_v63  ;;  %v247_v59 = vld [vmem:[#allocation5 + $0x548] sm:$0xff]  ;;  %v262_v61 = vld [vmem:[#allocation5 + $0x5c0] sm:$0xff] }
  0x66   :  { %1720 = vmatprep.subr.mxu1 %v194_v0  ;;  %1686 = vmatpush3.msra.mxu0 %v146_v3  ;;  %v214_v62 = vld [vmem:[#allocation5 + $0x440] sm:$0xff]  ;;  %v229_v0 = vld [vmem:[#allocation5 + $0x4b8] sm:$0xff] }
  0x67   :  { %1721 = vmatpush3.msra.mxu1 %v178_v4  ;;  %1687 = vmatprep.subr.mxu0 %v161_v5  ;;  %v246_v63 = vld [vmem:[#allocation5 + $0x540] sm:$0xff]  ;;  %v245_v3 = vld [vmem:[#allocation5 + $0x538] sm:$0xff]  ;;  %v228_v4 = vld [vmem:[#allocation5 + $0x4b0] sm:$0xff] }
  0x68   :  { %1722 = vmatprep.subr.mxu1 %v193_v6  ;;  %1688 = vmatpush3.msra.mxu0 %v145_v9  ;;  %v260_v5 = vld [vmem:[#allocation5 + $0x5b0] sm:$0xff]  ;;  %v259_v9 = vld [vmem:[#allocation5 + $0x5a8] sm:$0xff] }
  0x69   :  { %1723 = vmatpush3.msra.mxu1 %v177_v10  ;;  %1689 = vmatprep.subr.mxu0 %v160_v11  ;;  %v212_v6 = vld [vmem:[#allocation5 + $0x430] sm:$0xff]  ;;  %v211_v10 = vld [vmem:[#allocation5 + $0x428] sm:$0xff] }
  0x6a   :  { %1724 = vmatprep.subr.mxu1 %v192_v12  ;;  %1690 = vmatpush3.msra.mxu0 %v144_v15  ;;  %v243_v11 = vld [vmem:[#allocation5 + $0x528] sm:$0xff]  ;;  %v226_v12 = vld [vmem:[#allocation5 + $0x4a0] sm:$0xff] }
  0x6b   :  { %1725 = vmatpush3.msra.mxu1 %v176_v16  ;;  %1691 = vmatprep.subr.mxu0 %v159_v17  ;;  %v2036_v14 = vld [vmem:[#allocation2 + $0x10] ss:$48 sps:$4 sm:$0xff]   ;;  %v2040_v20 = vld [vmem:[#allocation2 + $0x14] ss:$48 sps:$4 sm:$0xff]  }
  0x6c   :  { %1726 = vmatprep.subr.mxu1 %v191_v18  ;;  %1692 = vmatpush3.msra.mxu0 %v143_v21  ;;  %v2038_v15 = vld [vmem:[#allocation2 + $0x70] ss:$48 sps:$4 sm:$0xff]   ;;  %v225_v18 = vld [vmem:[#allocation5 + $0x498] sm:$0xff]  ;;  %v2041_v21 = vld [vmem:[#allocation2 + $0x74] ss:$48 sps:$4 sm:$0xff]  }
  0x6d   :  { %1727 = vmatpush3.msra.mxu1 %v175_v22  ;;  %1693 = vmatprep.subr.mxu0 %v158_v23  ;;  %v210_v16 = vld [vmem:[#allocation5 + $0x420] sm:$0xff]  ;;  %v209_v22 = vld [vmem:[#allocation5 + $0x418] sm:$0xff] }
  0x6e   :  { %1728 = vmatprep.subr.mxu1 %v190_v24  ;;  %1694 = vmatpush3.msra.mxu0 %v142_v26  ;;  %v242_v17 = vld [vmem:[#allocation5 + $0x520] sm:$0xff]  ;;  %v241_v23 = vld [vmem:[#allocation5 + $0x518] sm:$0xff]  ;;  %v224_v24 = vld [vmem:[#allocation5 + $0x490] sm:$0xff] }
  0x6f   :  { %937 = vmatprep.mubr.f32.mxu0 %v562_v25  ;;  %1729 = vmatpush3.msra.mxu1 %v174_v28  ;;  %v256_v25 = vld [vmem:[#allocation5 + $0x590] sm:$0xff]  ;;  %v575_v28 = vrot.slane %v2036_v14, %v2186_v55  ;;  %v325_v14 = vld [vmem:[#allocation5 + $0x7b8] sm:$0xff] }
  0x70   :  { %938 = vmatmul.mubr.f32.vlgmr.msra.gmra.mxu0 %v561_v27  ;;  %1007 = vmatprep.mubr.f32.mxu1 %v564_v29  ;;  %v208_v26 = vld [vmem:[#allocation5 + $0x410] sm:$0xff]  ;;  %v589_v29 = vrot.slane %v2038_v15, %v2186_v55  ;;  %v277_v15 = vld [vmem:[#allocation5 + $0x638] sm:$0xff] }
  0x71   :  { %1733 = vmatprep.subr.mxu0 %v237_v30  ;;  %1768 = vmatprep.subr.mxu1 %v269_v32  ;;  %v240_v27 = vld [vmem:[#allocation5 + $0x510] sm:$0xff]  ;;  %v223_v30 = vld [vmem:[#allocation5 + $0x488] sm:$0xff]  ;;  %v582_v32 = vrot.slane %v2040_v20, %v2186_v55 }
  0x72   :  { %1008 = vmatmul.mubr.f32.vlgmr.msra.gmra.mxu1 %v563_v31  ;;  %1734 = vmatpush3.msra.mxu0 %v221_v33  ;;  %v255_v31 = vld [vmem:[#allocation5 + $0x588] sm:$0xff]  ;;  %v596_v33 = vrot.slane %v2041_v21, %v2186_v55  ;;  %v308_v20 = vld [vmem:[#allocation5 + $0x730] sm:$0xff] }
  0x73   :  { %1769 = vmatpush3.msra.mxu1 %v253_v34  ;;  %1735 = vmatprep.subr.mxu0 %v236_v35  ;;  %v207_v34 = vld [vmem:[#allocation5 + $0x408] sm:$0xff] }
  0x74   :  { %1770 = vmatprep.subr.mxu1 %v268_v36  ;;  %1736 = vmatpush3.msra.mxu0 %v220_v37  ;;  %v239_v35 = vld [vmem:[#allocation5 + $0x508] sm:$0xff]  ;;  %v222_v36 = vld [vmem:[#allocation5 + $0x480] sm:$0xff] }
  0x75   :  { %1771 = vmatpush3.msra.mxu1 %v252_v38  ;;  %1737 = vmatprep.subr.mxu0 %v235_v39  ;;  %v254_v37 = vld [vmem:[#allocation5 + $0x580] sm:$0xff]  ;;  %v598_v38 = vcombine.high %v575_v28, %v589_v29  ;;  %v291_v21 = vld [vmem:[#allocation5 + $0x6a8] sm:$0xff] }
  0x76   :  { %1772 = vmatprep.subr.mxu1 %v267_v40  ;;  %1738 = vmatpush3.msra.mxu0 %v219_v41  ;;  %v206_v39 = vld [vmem:[#allocation5 + $0x400] sm:$0xff]  ;;  %v597_v40 = vcombine.low %v575_v28, %v589_v29  ;;  %v2044_v28 = vld [vmem:[#allocation2 + $0x78] ss:$48 sps:$4 sm:$0xff]  }
  0x77   :  { %1773 = vmatpush3.msra.mxu1 %v251_v42  ;;  %1739 = vmatprep.subr.mxu0 %v234_v43  ;;  %v238_v41 = vld [vmem:[#allocation5 + $0x500] sm:$0xff]  ;;  %v600_v42 = vcombine.high %v582_v32, %v596_v33  ;;  %v301_v43 = vld [vmem:[#allocation5 + $0x6f8] sm:$0xff] }
  0x78   :  { %1774 = vmatprep.subr.mxu1 %v266_v44  ;;  %1740 = vmatpush3.msra.mxu0 %v218_v45  ;;  %v599_v44 = vcombine.low %v582_v32, %v596_v33  ;;  %v333_v45 = vld [vmem:[#allocation5 + $0x7f8] sm:$0xff]  ;;  %v274_v29 = vld [vmem:[#allocation5 + $0x620] sm:$0xff] }
  0x79   :  { %1775 = vmatpush3.msra.mxu1 %v250_v46  ;;  %1741 = vmatprep.subr.mxu0 %v233_v47  ;;  %v285_v46 = vld [vmem:[#allocation5 + $0x678] sm:$0xff] }
  0x7a   :  { %1776 = vmatprep.subr.mxu1 %v265_v48  ;;  %1742 = vmatpush3.msra.mxu0 %v217_v49  ;;  %v317_v47 = vld [vmem:[#allocation5 + $0x778] sm:$0xff]  ;;  %v300_v48 = vld [vmem:[#allocation5 + $0x6f0] sm:$0xff] }
  0x7b   :  { %1777 = vmatpush3.msra.mxu1 %v249_v50  ;;  %1743 = vmatprep.subr.mxu0 %v232_v51  ;;  %v332_v49 = vld [vmem:[#allocation5 + $0x7f0] sm:$0xff]  ;;  %v321_v32 = vld [vmem:[#allocation5 + $0x798] sm:$0xff] }
  0x7c   :  { %1778 = vmatprep.subr.mxu1 %v264_v52  ;;  %1744 = vmatpush3.msra.mxu0 %v216_v53  ;;  %v284_v50 = vld [vmem:[#allocation5 + $0x670] sm:$0xff]  ;;  %v299_v52 = vld [vmem:[#allocation5 + $0x6e8] sm:$0xff] }
  0x7d   :  { %1779 = vmatpush3.msra.mxu1 %v248_v54  ;;  %1745 = vmatprep.subr.mxu0 %v231_v56  ;;  %v316_v51 = vld [vmem:[#allocation5 + $0x770] sm:$0xff]  ;;  %v331_v53 = vld [vmem:[#allocation5 + $0x7e8] sm:$0xff] }
  0x7e   :  { %1780 = vmatprep.subr.mxu1 %v263_v57  ;;  %1746 = vmatpush3.msra.mxu0 %v215_v58  ;;  %v283_v54 = vld [vmem:[#allocation5 + $0x668] sm:$0xff]  ;;  %v298_v57 = vld [vmem:[#allocation5 + $0x6e0] sm:$0xff] }
  0x7f   :  { %1781 = vmatpush3.msra.mxu1 %v247_v59  ;;  %1747 = vmatprep.subr.mxu0 %v230_v60  ;;  %v315_v56 = vld [vmem:[#allocation5 + $0x768] sm:$0xff]  ;;  %v330_v58 = vld [vmem:[#allocation5 + $0x7e0] sm:$0xff] }
  0x80   :  { %1782 = vmatprep.subr.mxu1 %v262_v61  ;;  %1748 = vmatpush3.msra.mxu0 %v214_v62  ;;  %v282_v59 = vld [vmem:[#allocation5 + $0x660] sm:$0xff]  ;;  %v297_v61 = vld [vmem:[#allocation5 + $0x6d8] sm:$0xff] }
  0x81   :  { %1783 = vmatpush3.msra.mxu1 %v246_v63  ;;  %1749 = vmatprep.subr.mxu0 %v229_v0  ;;  %v314_v60 = vld [vmem:[#allocation5 + $0x760] sm:$0xff]  ;;  %v329_v62 = vld [vmem:[#allocation5 + $0x7d8] sm:$0xff] }
  0x82   :  { %1784 = vmatprep.subr.mxu1 %v261_v1  ;;  %1750 = vmatpush3.msra.mxu0 %v213_v2  ;;  %v281_v63 = vld [vmem:[#allocation5 + $0x658] sm:$0xff]  ;;  %v296_v1 = vld [vmem:[#allocation5 + $0x6d0] sm:$0xff] }
  0x83   :  { %1785 = vmatpush3.msra.mxu1 %v245_v3  ;;  %1751 = vmatprep.subr.mxu0 %v228_v4  ;;  %v313_v0 = vld [vmem:[#allocation5 + $0x758] sm:$0xff]  ;;  %v328_v2 = vld [vmem:[#allocation5 + $0x7d0] sm:$0xff] }
  0x84   :  { %1786 = vmatprep.subr.mxu1 %v260_v5  ;;  %1752 = vmatpush3.msra.mxu0 %v212_v6  ;;  %v280_v3 = vld [vmem:[#allocation5 + $0x650] sm:$0xff]  ;;  %v295_v5 = vld [vmem:[#allocation5 + $0x6c8] sm:$0xff] }
  0x85   :  { %1787 = vmatpush3.msra.mxu1 %v244_v7  ;;  %1753 = vmatprep.subr.mxu0 %v227_v8  ;;  %v312_v4 = vld [vmem:[#allocation5 + $0x750] sm:$0xff]  ;;  %v327_v6 = vld [vmem:[#allocation5 + $0x7c8] sm:$0xff] }
  0x86   :  { %1788 = vmatprep.subr.mxu1 %v259_v9  ;;  %1754 = vmatpush3.msra.mxu0 %v211_v10  ;;  %v279_v7 = vld [vmem:[#allocation5 + $0x648] sm:$0xff]  ;;  %v294_v9 = vld [vmem:[#allocation5 + $0x6c0] sm:$0xff] }
  0x87   :  { %1789 = vmatpush3.msra.mxu1 %v243_v11  ;;  %1755 = vmatprep.subr.mxu0 %v226_v12  ;;  %v311_v8 = vld [vmem:[#allocation5 + $0x748] sm:$0xff]  ;;  %v326_v10 = vld [vmem:[#allocation5 + $0x7c0] sm:$0xff] }
  0x88   :  { %1790 = vmatprep.subr.mxu1 %v258_v13  ;;  %1756 = vmatpush3.msra.mxu0 %v210_v16  ;;  %v278_v11 = vld [vmem:[#allocation5 + $0x640] sm:$0xff]  ;;  %v293_v13 = vld [vmem:[#allocation5 + $0x6b8] sm:$0xff] }
  0x89   :  { %1791 = vmatpush3.msra.mxu1 %v242_v17  ;;  %1757 = vmatprep.subr.mxu0 %v225_v18  ;;  %v310_v12 = vld [vmem:[#allocation5 + $0x740] sm:$0xff]  ;;  %v309_v16 = vld [vmem:[#allocation5 + $0x738] sm:$0xff]  ;;  %v292_v17 = vld [vmem:[#allocation5 + $0x6b0] sm:$0xff] }
  0x8a   :  { %1792 = vmatprep.subr.mxu1 %v257_v19  ;;  %1758 = vmatpush3.msra.mxu0 %v209_v22  ;;  %v324_v18 = vld [vmem:[#allocation5 + $0x7b0] sm:$0xff]  ;;  %v323_v22 = vld [vmem:[#allocation5 + $0x7a8] sm:$0xff] }
  0x8b   :  { %1793 = vmatpush3.msra.mxu1 %v241_v23  ;;  %1759 = vmatprep.subr.mxu0 %v224_v24  ;;  %v276_v19 = vld [vmem:[#allocation5 + $0x630] sm:$0xff]  ;;  %v275_v23 = vld [vmem:[#allocation5 + $0x628] sm:$0xff] }
  0x8c   :  { %1794 = vmatprep.subr.mxu1 %v256_v25  ;;  %1760 = vmatpush3.msra.mxu0 %v208_v26  ;;  %v307_v24 = vld [vmem:[#allocation5 + $0x728] sm:$0xff]  ;;  %v290_v25 = vld [vmem:[#allocation5 + $0x6a0] sm:$0xff] }
  0x8d   :  { %1795 = vmatpush3.msra.mxu1 %v240_v27  ;;  %1761 = vmatprep.subr.mxu0 %v223_v30  ;;  %v322_v26 = vld [vmem:[#allocation5 + $0x7a0] sm:$0xff]  ;;  %v2042_v27 = vld [vmem:[#allocation2 + $0x18] ss:$48 sps:$4 sm:$0xff]   ;;  %v2046_v33 = vld [vmem:[#allocation2 + $0x1c] ss:$48 sps:$4 sm:$0xff]  }
  0x8e   :  { %1796 = vmatprep.subr.mxu1 %v255_v31  ;;  %1762 = vmatpush3.msra.mxu0 %v207_v34  ;;  %v306_v30 = vld [vmem:[#allocation5 + $0x720] sm:$0xff]  ;;  %v289_v31 = vld [vmem:[#allocation5 + $0x698] sm:$0xff] }
  0x8f   :  { %1797 = vmatpush3.msra.mxu1 %v239_v35  ;;  %1763 = vmatprep.subr.mxu0 %v222_v36  ;;  %v2047_v34 = vld [vmem:[#allocation2 + $0x7c] ss:$48 sps:$4 sm:$0xff]  }
  0x90   :  { %1798 = vmatprep.subr.mxu1 %v254_v37  ;;  %1764 = vmatpush3.msra.mxu0 %v206_v39  ;;  %v273_v35 = vld [vmem:[#allocation5 + $0x618] sm:$0xff]  ;;  %v288_v37 = vld [vmem:[#allocation5 + $0x690] sm:$0xff]  ;;  %v611_v39 = vrot.slane %v2042_v27, %v2186_v55 }
  0x91   :  { %1077 = vmatprep.mubr.f32.mxu0 %v598_v38  ;;  %1799 = vmatpush3.msra.mxu1 %v238_v41  ;;  %v305_v36 = vld [vmem:[#allocation5 + $0x718] sm:$0xff]  ;;  %v320_v38 = vld [vmem:[#allocation5 + $0x790] sm:$0xff] }
  0x92   :  { %1078 = vmatmul.mubr.f32.vlgmr.msra.gmra.mxu0 %v597_v40  ;;  %1147 = vmatprep.mubr.f32.mxu1 %v600_v42  ;;  %v625_v40 = vrot.slane %v2044_v28, %v2186_v55  ;;  %v272_v41 = vld [vmem:[#allocation5 + $0x610] sm:$0xff]  ;;  %v389_v27 = vld [vmem:[#allocation5 + $0x9b8] sm:$0xff] }
  0x93   :  { %1803 = vmatprep.subr.mxu0 %v301_v43  ;;  %1838 = vmatprep.subr.mxu1 %v333_v45  ;;  %v304_v42 = vld [vmem:[#allocation5 + $0x710] sm:$0xff]  ;;  %v287_v43 = vld [vmem:[#allocation5 + $0x688] sm:$0xff]  ;;  %v618_v45 = vrot.slane %v2046_v33, %v2186_v55  ;;  %v341_v28 = vld [vmem:[#allocation5 + $0x838] sm:$0xff] }
  0x94   :  { %1148 = vmatmul.mubr.f32.vlgmr.msra.gmra.mxu1 %v599_v44  ;;  %1804 = vmatpush3.msra.mxu0 %v285_v46  ;;  %v319_v44 = vld [vmem:[#allocation5 + $0x788] sm:$0xff]  ;;  %v632_v46 = vrot.slane %v2047_v34, %v2186_v55  ;;  %v372_v33 = vld [vmem:[#allocation5 + $0x930] sm:$0xff] }
  0x95   :  { %1839 = vmatpush3.msra.mxu1 %v317_v47  ;;  %1805 = vmatprep.subr.mxu0 %v300_v48  ;;  %v271_v47 = vld [vmem:[#allocation5 + $0x608] sm:$0xff] }
  0x96   :  { %1840 = vmatprep.subr.mxu1 %v332_v49  ;;  %1806 = vmatpush3.msra.mxu0 %v284_v50  ;;  %v303_v48 = vld [vmem:[#allocation5 + $0x708] sm:$0xff]  ;;  %v286_v49 = vld [vmem:[#allocation5 + $0x680] sm:$0xff] }
  0x97   :  { %1841 = vmatpush3.msra.mxu1 %v316_v51  ;;  %1807 = vmatprep.subr.mxu0 %v299_v52  ;;  %v318_v50 = vld [vmem:[#allocation5 + $0x780] sm:$0xff]  ;;  %v634_v51 = vcombine.high %v611_v39, %v625_v40  ;;  %v355_v34 = vld [vmem:[#allocation5 + $0x8a8] sm:$0xff] }
  0x98   :  { %1842 = vmatprep.subr.mxu1 %v331_v53  ;;  %1808 = vmatpush3.msra.mxu0 %v283_v54  ;;  %v270_v52 = vld [vmem:[#allocation5 + $0x600] sm:$0xff]  ;;  %v633_v53 = vcombine.low %v611_v39, %v625_v40 }
  0x99   :  { %1843 = vmatpush3.msra.mxu1 %v315_v56  ;;  %1809 = vmatprep.subr.mxu0 %v298_v57  ;;  %v302_v54 = vld [vmem:[#allocation5 + $0x700] sm:$0xff]  ;;  %v636_v56 = vcombine.high %v618_v45, %v632_v46  ;;  %v365_v57 = vld [vmem:[#allocation5 + $0x8f8] sm:$0xff] }
  0x9a   :  { %1844 = vmatprep.subr.mxu1 %v330_v58  ;;  %1810 = vmatpush3.msra.mxu0 %v282_v59  ;;  %v635_v58 = vcombine.low %v618_v45, %v632_v46  ;;  %v397_v59 = vld [vmem:[#allocation5 + $0x9f8] sm:$0xff]  ;;  %v386_v39 = vld [vmem:[#allocation5 + $0x9a0] sm:$0xff] }
  0x9b   :  { %1845 = vmatpush3.msra.mxu1 %v314_v60  ;;  %1811 = vmatprep.subr.mxu0 %v297_v61  ;;  %v349_v60 = vld [vmem:[#allocation5 + $0x878] sm:$0xff]  ;;  %v2048_v40 = vld [vmem:[#allocation2 + $0x20] ss:$48 sps:$4 sm:$0xff]   ;;  %v2052_v46 = vld [vmem:[#allocation2 + $0x24] ss:$48 sps:$4 sm:$0xff]  }
  0x9c   :  { %1846 = vmatprep.subr.mxu1 %v329_v62  ;;  %1812 = vmatpush3.msra.mxu0 %v281_v63  ;;  %v381_v61 = vld [vmem:[#allocation5 + $0x978] sm:$0xff]  ;;  %v364_v62 = vld [vmem:[#allocation5 + $0x8f0] sm:$0xff] }
  0x9d   :  { %1847 = vmatpush3.msra.mxu1 %v313_v0  ;;  %1813 = vmatprep.subr.mxu0 %v296_v1  ;;  %v396_v63 = vld [vmem:[#allocation5 + $0x9f0] sm:$0xff]  ;;  %v385_v45 = vld [vmem:[#allocation5 + $0x998] sm:$0xff] }
  0x9e   :  { %1848 = vmatprep.subr.mxu1 %v328_v2  ;;  %1814 = vmatpush3.msra.mxu0 %v280_v3  ;;  %v348_v0 = vld [vmem:[#allocation5 + $0x870] sm:$0xff]  ;;  %v363_v2 = vld [vmem:[#allocation5 + $0x8e8] sm:$0xff] }
  0x9f   :  { %1849 = vmatpush3.msra.mxu1 %v312_v4  ;;  %1815 = vmatprep.subr.mxu0 %v295_v5  ;;  %v380_v1 = vld [vmem:[#allocation5 + $0x970] sm:$0xff]  ;;  %v395_v3 = vld [vmem:[#allocation5 + $0x9e8] sm:$0xff] }
  0xa0   :  { %1850 = vmatprep.subr.mxu1 %v327_v6  ;;  %1816 = vmatpush3.msra.mxu0 %v279_v7  ;;  %v347_v4 = vld [vmem:[#allocation5 + $0x868] sm:$0xff]  ;;  %v362_v6 = vld [vmem:[#allocation5 + $0x8e0] sm:$0xff] }
  0xa1   :  { %1851 = vmatpush3.msra.mxu1 %v311_v8  ;;  %1817 = vmatprep.subr.mxu0 %v294_v9  ;;  %v379_v5 = vld [vmem:[#allocation5 + $0x968] sm:$0xff]  ;;  %v394_v7 = vld [vmem:[#allocation5 + $0x9e0] sm:$0xff] }
  0xa2   :  { %1852 = vmatprep.subr.mxu1 %v326_v10  ;;  %1818 = vmatpush3.msra.mxu0 %v278_v11  ;;  %v346_v8 = vld [vmem:[#allocation5 + $0x860] sm:$0xff]  ;;  %v361_v10 = vld [vmem:[#allocation5 + $0x8d8] sm:$0xff] }
  0xa3   :  { %1853 = vmatpush3.msra.mxu1 %v310_v12  ;;  %1819 = vmatprep.subr.mxu0 %v293_v13  ;;  %v378_v9 = vld [vmem:[#allocation5 + $0x960] sm:$0xff]  ;;  %v393_v11 = vld [vmem:[#allocation5 + $0x9d8] sm:$0xff] }
  0xa4   :  { %1854 = vmatprep.subr.mxu1 %v325_v14  ;;  %1820 = vmatpush3.msra.mxu0 %v277_v15  ;;  %v345_v12 = vld [vmem:[#allocation5 + $0x858] sm:$0xff]  ;;  %v360_v14 = vld [vmem:[#allocation5 + $0x8d0] sm:$0xff] }
  0xa5   :  { %1855 = vmatpush3.msra.mxu1 %v309_v16  ;;  %1821 = vmatprep.subr.mxu0 %v292_v17  ;;  %v377_v13 = vld [vmem:[#allocation5 + $0x958] sm:$0xff]  ;;  %v392_v15 = vld [vmem:[#allocation5 + $0x9d0] sm:$0xff] }
  0xa6   :  { %1856 = vmatprep.subr.mxu1 %v324_v18  ;;  %1822 = vmatpush3.msra.mxu0 %v276_v19  ;;  %v344_v16 = vld [vmem:[#allocation5 + $0x850] sm:$0xff]  ;;  %v359_v18 = vld [vmem:[#allocation5 + $0x8c8] sm:$0xff] }
  0xa7   :  { %1857 = vmatpush3.msra.mxu1 %v308_v20  ;;  %1823 = vmatprep.subr.mxu0 %v291_v21  ;;  %v376_v17 = vld [vmem:[#allocation5 + $0x950] sm:$0xff]  ;;  %v391_v19 = vld [vmem:[#allocation5 + $0x9c8] sm:$0xff] }
  0xa8   :  { %1858 = vmatprep.subr.mxu1 %v323_v22  ;;  %1824 = vmatpush3.msra.mxu0 %v275_v23  ;;  %v343_v20 = vld [vmem:[#allocation5 + $0x848] sm:$0xff]  ;;  %v358_v22 = vld [vmem:[#allocation5 + $0x8c0] sm:$0xff] }
  0xa9   :  { %1859 = vmatpush3.msra.mxu1 %v307_v24  ;;  %1825 = vmatprep.subr.mxu0 %v290_v25  ;;  %v375_v21 = vld [vmem:[#allocation5 + $0x948] sm:$0xff]  ;;  %v390_v23 = vld [vmem:[#allocation5 + $0x9c0] sm:$0xff] }
  0xaa   :  { %1860 = vmatprep.subr.mxu1 %v322_v26  ;;  %1826 = vmatpush3.msra.mxu0 %v274_v29  ;;  %v342_v24 = vld [vmem:[#allocation5 + $0x840] sm:$0xff]  ;;  %v357_v26 = vld [vmem:[#allocation5 + $0x8b8] sm:$0xff] }
  0xab   :  { %1861 = vmatpush3.msra.mxu1 %v306_v30  ;;  %1827 = vmatprep.subr.mxu0 %v289_v31  ;;  %v374_v25 = vld [vmem:[#allocation5 + $0x940] sm:$0xff]  ;;  %v373_v29 = vld [vmem:[#allocation5 + $0x938] sm:$0xff]  ;;  %v356_v30 = vld [vmem:[#allocation5 + $0x8b0] sm:$0xff] }
  0xac   :  { %1862 = vmatprep.subr.mxu1 %v321_v32  ;;  %1828 = vmatpush3.msra.mxu0 %v273_v35  ;;  %v388_v31 = vld [vmem:[#allocation5 + $0x9b0] sm:$0xff]  ;;  %v387_v35 = vld [vmem:[#allocation5 + $0x9a8] sm:$0xff] }
  0xad   :  { %1863 = vmatpush3.msra.mxu1 %v305_v36  ;;  %1829 = vmatprep.subr.mxu0 %v288_v37  ;;  %v340_v32 = vld [vmem:[#allocation5 + $0x830] sm:$0xff]  ;;  %v339_v36 = vld [vmem:[#allocation5 + $0x828] sm:$0xff] }
  0xae   :  { %1864 = vmatprep.subr.mxu1 %v320_v38  ;;  %1830 = vmatpush3.msra.mxu0 %v272_v41  ;;  %v371_v37 = vld [vmem:[#allocation5 + $0x928] sm:$0xff]  ;;  %v354_v38 = vld [vmem:[#allocation5 + $0x8a0] sm:$0xff] }
  0xaf   :  { %1865 = vmatpush3.msra.mxu1 %v304_v42  ;;  %1831 = vmatprep.subr.mxu0 %v287_v43  ;;  %v2050_v41 = vld [vmem:[#allocation2 + $0x80] ss:$48 sps:$4 sm:$0xff]  }
  0xb0   :  { %1866 = vmatprep.subr.mxu1 %v319_v44  ;;  %1832 = vmatpush3.msra.mxu0 %v271_v47  ;;  %v338_v42 = vld [vmem:[#allocation5 + $0x820] sm:$0xff]  ;;  %v353_v44 = vld [vmem:[#allocation5 + $0x898] sm:$0xff] }
  0xb1   :  { %1867 = vmatpush3.msra.mxu1 %v303_v48  ;;  %1833 = vmatprep.subr.mxu0 %v286_v49  ;;  %v370_v43 = vld [vmem:[#allocation5 + $0x920] sm:$0xff]  ;;  %v337_v48 = vld [vmem:[#allocation5 + $0x818] sm:$0xff] }
  0xb2   :  { %1868 = vmatprep.subr.mxu1 %v318_v50  ;;  %1834 = vmatpush3.msra.mxu0 %v270_v52  ;;  %v2053_v47 = vld [vmem:[#allocation2 + $0x84] ss:$48 sps:$4 sm:$0xff]   ;;  %v369_v49 = vld [vmem:[#allocation5 + $0x918] sm:$0xff]  ;;  %v647_v52 = vrot.slane %v2048_v40, %v2186_v55 }
  0xb3   :  { %1217 = vmatprep.mubr.f32.mxu0 %v634_v51  ;;  %1869 = vmatpush3.msra.mxu1 %v302_v54  ;;  %v352_v50 = vld [vmem:[#allocation5 + $0x890] sm:$0xff]  ;;  %v453_v40 = vld [vmem:[#allocation5 + $0xbb8] sm:$0xff] }
  0xb4   :  { %1218 = vmatmul.mubr.f32.vlgmr.msra.gmra.mxu0 %v633_v53  ;;  %1287 = vmatprep.mubr.f32.mxu1 %v636_v56  ;;  %v384_v51 = vld [vmem:[#allocation5 + $0x990] sm:$0xff]  ;;  %v661_v53 = vrot.slane %v2050_v41, %v2186_v55  ;;  %v405_v41 = vld [vmem:[#allocation5 + $0xa38] sm:$0xff] }
  0xb5   :  { %1873 = vmatprep.subr.mxu0 %v365_v57  ;;  %1908 = vmatprep.subr.mxu1 %v397_v59  ;;  %v336_v54 = vld [vmem:[#allocation5 + $0x810] sm:$0xff]  ;;  %v351_v57 = vld [vmem:[#allocation5 + $0x888] sm:$0xff]  ;;  %v654_v59 = vrot.slane %v2052_v46, %v2186_v55 }
  0xb6   :  { %1288 = vmatmul.mubr.f32.vlgmr.msra.gmra.mxu1 %v635_v58  ;;  %1874 = vmatpush3.msra.mxu0 %v349_v60  ;;  %v368_v56 = vld [vmem:[#allocation5 + $0x910] sm:$0xff]  ;;  %v383_v58 = vld [vmem:[#allocation5 + $0x988] sm:$0xff]  ;;  %v668_v60 = vrot.slane %v2053_v47, %v2186_v55 }
  0xb7   :  { %1909 = vmatpush3.msra.mxu1 %v381_v61  ;;  %1875 = vmatprep.subr.mxu0 %v364_v62  ;;  %v335_v61 = vld [vmem:[#allocation5 + $0x808] sm:$0xff]  ;;  %v436_v46 = vld [vmem:[#allocation5 + $0xb30] sm:$0xff] }
  0xb8   :  { %1910 = vmatprep.subr.mxu1 %v396_v63  ;;  %1876 = vmatpush3.msra.mxu0 %v348_v0  ;;  %v367_v62 = vld [vmem:[#allocation5 + $0x908] sm:$0xff]  ;;  %v350_v63 = vld [vmem:[#allocation5 + $0x880] sm:$0xff] }
  0xb9   :  { %1911 = vmatpush3.msra.mxu1 %v380_v1  ;;  %1877 = vmatprep.subr.mxu0 %v363_v2  ;;  %v382_v0 = vld [vmem:[#allocation5 + $0x980] sm:$0xff]  ;;  %v670_v1 = vcombine.high %v647_v52, %v661_v53  ;;  %v419_v47 = vld [vmem:[#allocation5 + $0xaa8] sm:$0xff] }
  0xba   :  { %1912 = vmatprep.subr.mxu1 %v395_v3  ;;  %1878 = vmatpush3.msra.mxu0 %v347_v4  ;;  %v334_v2 = vld [vmem:[#allocation5 + $0x800] sm:$0xff]  ;;  %v669_v3 = vcombine.low %v647_v52, %v661_v53 }
  0xbb   :  { %1913 = vmatpush3.msra.mxu1 %v379_v5  ;;  %1879 = vmatprep.subr.mxu0 %v362_v6  ;;  %v366_v4 = vld [vmem:[#allocation5 + $0x900] sm:$0xff]  ;;  %v672_v5 = vcombine.high %v654_v59, %v668_v60  ;;  %v429_v6 = vld [vmem:[#allocation5 + $0xaf8] sm:$0xff] }
  0xbc   :  { %1914 = vmatprep.subr.mxu1 %v394_v7  ;;  %1880 = vmatpush3.msra.mxu0 %v346_v8  ;;  %v671_v7 = vcombine.low %v654_v59, %v668_v60  ;;  %v461_v8 = vld [vmem:[#allocation5 + $0xbf8] sm:$0xff]  ;;  %v450_v52 = vld [vmem:[#allocation5 + $0xba0] sm:$0xff] }
  0xbd   :  { %1915 = vmatpush3.msra.mxu1 %v378_v9  ;;  %1881 = vmatprep.subr.mxu0 %v361_v10  ;;  %v413_v9 = vld [vmem:[#allocation5 + $0xa78] sm:$0xff]  ;;  %v402_v53 = vld [vmem:[#allocation5 + $0xa20] sm:$0xff] }
  0xbe   :  { %1916 = vmatprep.subr.mxu1 %v393_v11  ;;  %1882 = vmatpush3.msra.mxu0 %v345_v12  ;;  %v445_v10 = vld [vmem:[#allocation5 + $0xb78] sm:$0xff]  ;;  %v428_v11 = vld [vmem:[#allocation5 + $0xaf0] sm:$0xff] }
  0xbf   :  { %1917 = vmatpush3.msra.mxu1 %v377_v13  ;;  %1883 = vmatprep.subr.mxu0 %v360_v14  ;;  %v460_v12 = vld [vmem:[#allocation5 + $0xbf0] sm:$0xff]  ;;  %v2059_v59 = vld [vmem:[#allocation2 + $0x8c] ss:$48 sps:$4 sm:$0xff]  }
  0xc0   :  { %1918 = vmatprep.subr.mxu1 %v392_v15  ;;  %1884 = vmatpush3.msra.mxu0 %v344_v16  ;;  %v412_v13 = vld [vmem:[#allocation5 + $0xa70] sm:$0xff]  ;;  %v427_v15 = vld [vmem:[#allocation5 + $0xae8] sm:$0xff]  ;;  %v417_v60 = vld [vmem:[#allocation5 + $0xa98] sm:$0xff] }
  0xc1   :  { %1919 = vmatpush3.msra.mxu1 %v376_v17  ;;  %1885 = vmatprep.subr.mxu0 %v359_v18  ;;  %v444_v14 = vld [vmem:[#allocation5 + $0xb70] sm:$0xff]  ;;  %v459_v16 = vld [vmem:[#allocation5 + $0xbe8] sm:$0xff] }
  0xc2   :  { %1920 = vmatprep.subr.mxu1 %v391_v19  ;;  %1886 = vmatpush3.msra.mxu0 %v343_v20  ;;  %v411_v17 = vld [vmem:[#allocation5 + $0xa68] sm:$0xff]  ;;  %v426_v19 = vld [vmem:[#allocation5 + $0xae0] sm:$0xff] }
  0xc3   :  { %1921 = vmatpush3.msra.mxu1 %v375_v21  ;;  %1887 = vmatprep.subr.mxu0 %v358_v22  ;;  %v443_v18 = vld [vmem:[#allocation5 + $0xb68] sm:$0xff]  ;;  %v458_v20 = vld [vmem:[#allocation5 + $0xbe0] sm:$0xff] }
  0xc4   :  { %1922 = vmatprep.subr.mxu1 %v390_v23  ;;  %1888 = vmatpush3.msra.mxu0 %v342_v24  ;;  %v410_v21 = vld [vmem:[#allocation5 + $0xa60] sm:$0xff]  ;;  %v425_v23 = vld [vmem:[#allocation5 + $0xad8] sm:$0xff] }
  0xc5   :  { %1923 = vmatpush3.msra.mxu1 %v374_v25  ;;  %1889 = vmatprep.subr.mxu0 %v357_v26  ;;  %v442_v22 = vld [vmem:[#allocation5 + $0xb60] sm:$0xff]  ;;  %v457_v24 = vld [vmem:[#allocation5 + $0xbd8] sm:$0xff] }
  0xc6   :  { %1924 = vmatprep.subr.mxu1 %v389_v27  ;;  %1890 = vmatpush3.msra.mxu0 %v341_v28  ;;  %v409_v25 = vld [vmem:[#allocation5 + $0xa58] sm:$0xff]  ;;  %v424_v27 = vld [vmem:[#allocation5 + $0xad0] sm:$0xff] }
  0xc7   :  { %1925 = vmatpush3.msra.mxu1 %v373_v29  ;;  %1891 = vmatprep.subr.mxu0 %v356_v30  ;;  %v441_v26 = vld [vmem:[#allocation5 + $0xb58] sm:$0xff]  ;;  %v456_v28 = vld [vmem:[#allocation5 + $0xbd0] sm:$0xff] }
  0xc8   :  { %1926 = vmatprep.subr.mxu1 %v388_v31  ;;  %1892 = vmatpush3.msra.mxu0 %v340_v32  ;;  %v408_v29 = vld [vmem:[#allocation5 + $0xa50] sm:$0xff]  ;;  %v423_v31 = vld [vmem:[#allocation5 + $0xac8] sm:$0xff] }
  0xc9   :  { %1927 = vmatpush3.msra.mxu1 %v372_v33  ;;  %1893 = vmatprep.subr.mxu0 %v355_v34  ;;  %v440_v30 = vld [vmem:[#allocation5 + $0xb50] sm:$0xff]  ;;  %v455_v32 = vld [vmem:[#allocation5 + $0xbc8] sm:$0xff] }
  0xca   :  { %1928 = vmatprep.subr.mxu1 %v387_v35  ;;  %1894 = vmatpush3.msra.mxu0 %v339_v36  ;;  %v407_v33 = vld [vmem:[#allocation5 + $0xa48] sm:$0xff]  ;;  %v422_v35 = vld [vmem:[#allocation5 + $0xac0] sm:$0xff] }
  0xcb   :  { %1929 = vmatpush3.msra.mxu1 %v371_v37  ;;  %1895 = vmatprep.subr.mxu0 %v354_v38  ;;  %v439_v34 = vld [vmem:[#allocation5 + $0xb48] sm:$0xff]  ;;  %v454_v36 = vld [vmem:[#allocation5 + $0xbc0] sm:$0xff] }
  0xcc   :  { %1930 = vmatprep.subr.mxu1 %v386_v39  ;;  %1896 = vmatpush3.msra.mxu0 %v338_v42  ;;  %v406_v37 = vld [vmem:[#allocation5 + $0xa40] sm:$0xff]  ;;  %v421_v39 = vld [vmem:[#allocation5 + $0xab8] sm:$0xff] }
  0xcd   :  { %1931 = vmatpush3.msra.mxu1 %v370_v43  ;;  %1897 = vmatprep.subr.mxu0 %v353_v44  ;;  %v438_v38 = vld [vmem:[#allocation5 + $0xb40] sm:$0xff]  ;;  %v437_v42 = vld [vmem:[#allocation5 + $0xb38] sm:$0xff]  ;;  %v420_v43 = vld [vmem:[#allocation5 + $0xab0] sm:$0xff] }
  0xce   :  { %1932 = vmatprep.subr.mxu1 %v385_v45  ;;  %1898 = vmatpush3.msra.mxu0 %v337_v48  ;;  %v452_v44 = vld [vmem:[#allocation5 + $0xbb0] sm:$0xff]  ;;  %v451_v48 = vld [vmem:[#allocation5 + $0xba8] sm:$0xff] }
  0xcf   :  { %1933 = vmatpush3.msra.mxu1 %v369_v49  ;;  %1899 = vmatprep.subr.mxu0 %v352_v50  ;;  %v404_v45 = vld [vmem:[#allocation5 + $0xa30] sm:$0xff]  ;;  %v403_v49 = vld [vmem:[#allocation5 + $0xa28] sm:$0xff] }
  0xd0   :  { %1934 = vmatprep.subr.mxu1 %v384_v51  ;;  %1900 = vmatpush3.msra.mxu0 %v336_v54  ;;  %v435_v50 = vld [vmem:[#allocation5 + $0xb28] sm:$0xff]  ;;  %v418_v51 = vld [vmem:[#allocation5 + $0xaa0] sm:$0xff] }
  0xd1   :  { %1935 = vmatpush3.msra.mxu1 %v368_v56  ;;  %1901 = vmatprep.subr.mxu0 %v351_v57  ;;  %v2054_v54 = vld [vmem:[#allocation2 + $0x28] ss:$48 sps:$4 sm:$0xff]   ;;  %v434_v57 = vld [vmem:[#allocation5 + $0xb20] sm:$0xff] }
  0xd2   :  { %1936 = vmatprep.subr.mxu1 %v383_v58  ;;  %1902 = vmatpush3.msra.mxu0 %v335_v61  ;;  %v2056_v56 = vld [vmem:[#allocation2 + $0x88] ss:$48 sps:$4 sm:$0xff]   ;;  %v2058_v58 = vld [vmem:[#allocation2 + $0x2c] ss:$48 sps:$4 sm:$0xff]  }
  0xd3   :  { %1937 = vmatpush3.msra.mxu1 %v367_v62  ;;  %1903 = vmatprep.subr.mxu0 %v350_v63  ;;  %v449_v61 = vld [vmem:[#allocation5 + $0xb98] sm:$0xff] }
  0xd4   :  { %1938 = vmatprep.subr.mxu1 %v382_v0  ;;  %1904 = vmatpush3.msra.mxu0 %v334_v2  ;;  %v401_v62 = vld [vmem:[#allocation5 + $0xa18] sm:$0xff]  ;;  %v416_v0 = vld [vmem:[#allocation5 + $0xa90] sm:$0xff]  ;;  %v683_v2 = vrot.slane %v2054_v54, %v2186_v55 }
  0xd5   :  { %1357 = vmatprep.mubr.f32.mxu0 %v670_v1  ;;  %1939 = vmatpush3.msra.mxu1 %v366_v4  ;;  %v433_v63 = vld [vmem:[#allocation5 + $0xb18] sm:$0xff]  ;;  %v448_v1 = vld [vmem:[#allocation5 + $0xb90] sm:$0xff] }
  0xd6   :  { %1358 = vmatmul.mubr.f32.vlgmr.msra.gmra.mxu0 %v669_v3  ;;  %1427 = vmatprep.mubr.f32.mxu1 %v672_v5  ;;  %v697_v3 = vrot.slane %v2056_v56, %v2186_v55  ;;  %v400_v4 = vld [vmem:[#allocation5 + $0xa10] sm:$0xff] }
  0xd7   :  { %1943 = vmatprep.subr.mxu0 %v429_v6  ;;  %1978 = vmatprep.subr.mxu1 %v461_v8  ;;  %v432_v5 = vld [vmem:[#allocation5 + $0xb10] sm:$0xff]  ;;  %v690_v6 = vrot.slane %v2058_v58, %v2186_v55  ;;  %v415_v8 = vld [vmem:[#allocation5 + $0xa88] sm:$0xff] }
  0xd8   :  { %1428 = vmatmul.mubr.f32.vlgmr.msra.gmra.mxu1 %v671_v7  ;;  %1944 = vmatpush3.msra.mxu0 %v413_v9  ;;  %v704_v7 = vrot.slane %v2059_v59, %v2186_v55  ;;  %v447_v9 = vld [vmem:[#allocation5 + $0xb88] sm:$0xff]  ;;  %v430_v55 = vld [vmem:[#allocation5 + $0xb00] sm:$0xff] }
  0xd9   :  { %1979 = vmatpush3.msra.mxu1 %v445_v10  ;;  %1945 = vmatprep.subr.mxu0 %v428_v11  ;;  %v399_v10 = vld [vmem:[#allocation5 + $0xa08] sm:$0xff] }
  0xda   :  { %1980 = vmatprep.subr.mxu1 %v460_v12  ;;  %1946 = vmatpush3.msra.mxu0 %v412_v13  ;;  %v431_v11 = vld [vmem:[#allocation5 + $0xb08] sm:$0xff]  ;;  %v414_v12 = vld [vmem:[#allocation5 + $0xa80] sm:$0xff] }
  0xdb   :  { %1981 = vmatpush3.msra.mxu1 %v444_v14  ;;  %1947 = vmatprep.subr.mxu0 %v427_v15  ;;  %v446_v13 = vld [vmem:[#allocation5 + $0xb80] sm:$0xff]  ;;  %v706_v14 = vcombine.high %v683_v2, %v697_v3 }
  0xdc   :  { %1982 = vmatprep.subr.mxu1 %v459_v16  ;;  %1948 = vmatpush3.msra.mxu0 %v411_v17  ;;  %v398_v15 = vld [vmem:[#allocation5 + $0xa00] sm:$0xff]  ;;  %v708_v16 = vcombine.high %v690_v6, %v704_v7  ;;  %v705_v17 = vcombine.low %v683_v2, %v697_v3 }
  0xdd   :  { %1983 = vmatpush3.msra.mxu1 %v443_v18  ;;  %1949 = vmatprep.subr.mxu0 %v426_v19  ;;  %v707_v18 = vcombine.low %v690_v6, %v704_v7 }
  0xde   :  { %1984 = vmatprep.subr.mxu1 %v458_v20  ;;  %1950 = vmatpush3.msra.mxu0 %v410_v21 }
  0xdf   :  { %1985 = vmatpush3.msra.mxu1 %v442_v22  ;;  %1951 = vmatprep.subr.mxu0 %v425_v23 }
  0xe0   :  { %1986 = vmatprep.subr.mxu1 %v457_v24  ;;  %1952 = vmatpush3.msra.mxu0 %v409_v25  ;;  %v1592_v24 = vld [vmem:[#allocation7] ss:$0 sm:$0xff] }
  0xe1   :  { %1987 = vmatpush3.msra.mxu1 %v441_v26  ;;  %1953 = vmatprep.subr.mxu0 %v424_v27 }
  0xe2   :  { %1988 = vmatprep.subr.mxu1 %v456_v28  ;;  %1954 = vmatpush3.msra.mxu0 %v408_v29 }
  0xe3   :  { %1989 = vmatpush3.msra.mxu1 %v440_v30  ;;  %1955 = vmatprep.subr.mxu0 %v423_v31 }
  0xe4   :  { %1990 = vmatprep.subr.mxu1 %v455_v32  ;;  %1956 = vmatpush3.msra.mxu0 %v407_v33 }
  0xe5   :  { %1991 = vmatpush3.msra.mxu1 %v439_v34  ;;  %1957 = vmatprep.subr.mxu0 %v422_v35 }
  0xe6   :  { %1992 = vmatprep.subr.mxu1 %v454_v36  ;;  %1958 = vmatpush3.msra.mxu0 %v406_v37 }
  0xe7   :  { %1993 = vmatpush3.msra.mxu1 %v438_v38  ;;  %1959 = vmatprep.subr.mxu0 %v421_v39 }
  0xe8   :  { %1994 = vmatprep.subr.mxu1 %v453_v40  ;;  %1960 = vmatpush3.msra.mxu0 %v405_v41 }
  0xe9   :  { %1995 = vmatpush3.msra.mxu1 %v437_v42  ;;  %1961 = vmatprep.subr.mxu0 %v420_v43 }
  0xea   :  { %1996 = vmatprep.subr.mxu1 %v452_v44  ;;  %1962 = vmatpush3.msra.mxu0 %v404_v45 }
  0xeb   :  { %1997 = vmatpush3.msra.mxu1 %v436_v46  ;;  %1963 = vmatprep.subr.mxu0 %v419_v47 }
  0xec   :  { %1998 = vmatprep.subr.mxu1 %v451_v48  ;;  %1964 = vmatpush3.msra.mxu0 %v403_v49 }
  0xed   :  { %1999 = vmatpush3.msra.mxu1 %v435_v50  ;;  %1965 = vmatprep.subr.mxu0 %v418_v51 }
  0xee   :  { %2000 = vmatprep.subr.mxu1 %v450_v52  ;;  %1966 = vmatpush3.msra.mxu0 %v402_v53 }
  0xef   :  { %2001 = vmatpush3.msra.mxu1 %v434_v57  ;;  %1967 = vmatprep.subr.mxu0 %v417_v60 }
  0xf0   :  { %2002 = vmatprep.subr.mxu1 %v449_v61  ;;  %1968 = vmatpush3.msra.mxu0 %v401_v62 }
  0xf1   :  { %2003 = vmatpush3.msra.mxu1 %v433_v63  ;;  %1969 = vmatprep.subr.mxu0 %v416_v0 }
  0xf2   :  { %2004 = vmatprep.subr.mxu1 %v448_v1  ;;  %1970 = vmatpush3.msra.mxu0 %v400_v4 }
  0xf3   :  { %2005 = vmatpush3.msra.mxu1 %v432_v5  ;;  %1971 = vmatprep.subr.mxu0 %v415_v8 }
  0xf4   :  { %2006 = vmatprep.subr.mxu1 %v447_v9  ;;  %1972 = vmatpush3.msra.mxu0 %v399_v10 }
  0xf5   :  { %2007 = vmatpush3.msra.mxu1 %v431_v11  ;;  %1973 = vmatprep.subr.mxu0 %v414_v12 }
  0xf6   :  { %2008 = vmatprep.subr.mxu1 %v446_v13  ;;  %1974 = vmatpush3.msra.mxu0 %v398_v15 }
  0xf7   :  { %1497 = vmatprep.mubr.f32.mxu0 %v706_v14  ;;  %2009 = vmatpush3.msra.mxu1 %v430_v55 }
  0xf8   :  { %1567 = vmatprep.mubr.f32.mxu1 %v708_v16  ;;  %1498 = vmatmul.mubr.f32.vlgmr.msra.gmra.mxu0 %v705_v17 }
  0xf9   :  { %1568 = vmatmul.mubr.f32.vlgmr.msra.gmra.mxu1 %v707_v18 }
 0x10e   :  { %v1625_v19 = vpop.f32.mrf.mxu0 }
 0x110   :  { %v1660_v20 = vpop.f32.mrf.mxu1  ;;  %v1626_v21 = vpop.f32.mrf.mxu0 }
 0x111   :  { %v1627_v23 = vadd.f32 %v1626_v21, %v1625_v19 }
 0x112   :  { %v1661_v25 = vpop.f32.mrf.mxu1 }
 0x113   :  { %v800_v28 = vadd.f32 %v1627_v23, %v1592_v24  ;;  %v1662_v29 = vadd.f32 %v1661_v25, %v1660_v20 }
 0x115   :  { %v870_v33 = vadd.f32 %v1662_v29, %v800_v28 }
 0x130   :  { %v1695_v22 = vpop.f32.mrf.mxu0 }
 0x132   :  { %v1730_v26 = vpop.f32.mrf.mxu1  ;;  %v1696_v27 = vpop.f32.mrf.mxu0 }
 0x133   :  { %v1697_v31 = vadd.f32 %v1696_v27, %v1695_v22 }
 0x134   :  { %v1731_v32 = vpop.f32.mrf.mxu1 }
 0x135   :  { %v940_v36 = vadd.f32 %v1697_v31, %v870_v33  ;;  %v1732_v37 = vadd.f32 %v1731_v32, %v1730_v26 }
 0x137   :  { %v1010_v41 = vadd.f32 %v1732_v37, %v940_v36 }
 0x152   :  { %v1765_v30 = vpop.f32.mrf.mxu0 }
 0x154   :  { %v1800_v34 = vpop.f32.mrf.mxu1  ;;  %v1766_v35 = vpop.f32.mrf.mxu0 }
 0x155   :  { %v1767_v39 = vadd.f32 %v1766_v35, %v1765_v30 }
 0x156   :  { %v1801_v40 = vpop.f32.mrf.mxu1 }
 0x157   :  { %v1080_v44 = vadd.f32 %v1767_v39, %v1010_v41  ;;  %v1802_v45 = vadd.f32 %v1801_v40, %v1800_v34 }
 0x159   :  { %v1150_v49 = vadd.f32 %v1802_v45, %v1080_v44 }
 0x174   :  { %v1835_v38 = vpop.f32.mrf.mxu0 }
 0x176   :  { %v1870_v42 = vpop.f32.mrf.mxu1  ;;  %v1836_v43 = vpop.f32.mrf.mxu0 }
 0x177   :  { %v1837_v47 = vadd.f32 %v1836_v43, %v1835_v38 }
 0x178   :  { %v1871_v48 = vpop.f32.mrf.mxu1 }
 0x179   :  { %v1220_v52 = vadd.f32 %v1837_v47, %v1150_v49  ;;  %v1872_v53 = vadd.f32 %v1871_v48, %v1870_v42 }
 0x17b   :  { %v1290_v57 = vadd.f32 %v1872_v53, %v1220_v52 }
 0x196   :  { %v1905_v46 = vpop.f32.mrf.mxu0 }
 0x198   :  { %v1940_v50 = vpop.f32.mrf.mxu1  ;;  %v1906_v51 = vpop.f32.mrf.mxu0 }
 0x199   :  { %v1907_v54 = vadd.f32 %v1906_v51, %v1905_v46 }
 0x19a   :  { %v1941_v56 = vpop.f32.mrf.mxu1 }
 0x19b   :  { %v1360_v58 = vadd.f32 %v1907_v54, %v1290_v57  ;;  %v1942_v59 = vadd.f32 %v1941_v56, %v1940_v50 }
 0x19d   :  { %v1430_v0 = vadd.f32 %v1942_v59, %v1360_v58 }
 0x1b8   :  { %v1975_v60 = vpop.f32.mrf.mxu0 }
 0x1b9   :  { %v2010_v61 = vpop.f32.mrf.mxu1 }
 0x1ba   :  { %v1976_v62 = vpop.f32.mrf.mxu0 }
 0x1bb   :  { %v2011_v63 = vpop.f32.mrf.mxu1  ;;  %v1977_v1 = vadd.f32 %v1976_v62, %v1975_v60 }
 0x1bc   :  { %v2012_v3 = vadd.f32 %v2011_v63, %v2010_v61 }
 0x1bd   :  { %v1500_v2 = vadd.f32 %v1977_v1, %v1430_v0 }
 0x1bf   :  { %v1570_v4 = vadd.f32 %v2012_v3, %v1500_v2 }
 0x1c1   :  { %1573 = vst [vmem:[#allocation8] sm:$0xff] %v1570_v4 }
 0x1c2   :  { %1578 = vsyncadd [#allocation4], 96  ;;  %s2154_s0 = smov [#allocation8]  }
 0x1c3   :  { %s1579_s2 = sshll.u32 %s2154_s0, 4  ;;  %s1580_s2 = int_to_ptr.vmem [resolvable:$true] %s1579_s2 }
 0x1c4   :  { %s2120_s5 = scalar_lea.vmem %s1580_s2, 32  ;;  %s2124_s6 = scalar_lea.vmem %s1580_s2, 128 }
 0x1c5   :  { %p2121_p1 = scmp.ne.s32.totalorder %s1580_s2, %s2120_s5  ;;  %p2125_p2 = scmp.lt.s32.totalorder %s1580_s2, %s1580_s2 }
 0x1c6   :  { %p2126_p3 = scmp.lt.s32.totalorder %s2124_s6, %s2120_s5 }
 0x1c8   :  { %p2127_p4 = por %p2126_p3, %p2125_p2 }
 0x1ca   :  { %p2128_p5 = pnand %p2127_p4, %p2121_p1 }
 0x1cc   :  { %2131 = shalt.err (!%p2128_p5)
}
 0x1cd   :  { %s2155_s7 = smov 32   ;;  %s2156_s8 = smov 2  }
 0x1ce   :  { %1585 = dma.vmem_to_hbm [thread:$0]  %s1580_s2, 32, %s2218_s3, [#allocation4], %s2155_s7, %s2155_s7, %s2156_s8  }
 0x1cf   :  { %2144 = dma.done.wait [#allocation4], 128  }
 0x1d0   :  { %2145 = vsyncadd [#allocation4], 4294967168 }
 0x1d1   :  { %1589 = vsyncpa [#allocation3], 1 }
 0x1d2   :  { %1590 = vsyncpa [#allocation6], 1 }
 0x1d3   :  { %1591 = vsyncpa [#allocation4], 1 }

</bundles_post_ra>
